<compile_context>
chip_gen: v5e
topology: v5e:2x2
jax: 0.10.0
libtpu: 0.0.40
codegen_flags: <defaults>
</compile_context>

<pallas_src>
import functools
import math

import jax
import jax.numpy as jnp
from jax.experimental import pallas as pl
from jax.experimental.pallas import tpu as pltpu

MXU_DTYPE = jnp.bfloat16            # matmul operand / activation storage dtype


def _vmem_limit_bytes():
    """Per-generation scoped-VMEM budget (v5e/v6e: 128 MiB physical, v7x: 64 MiB)."""
    try:
        kind = jax.devices()[0].device_kind.lower()
    except Exception:
        kind = ""
    if "v7" in kind:
        return 48 * 1024 * 1024
    if "v5" in kind or "v6" in kind:
        return 100 * 1024 * 1024
    return 32 * 1024 * 1024


VMEM_LIMIT = _vmem_limit_bytes()
_BIG_VMEM = VMEM_LIMIT >= 96 * 1024 * 1024
_DEF_TM = 512 if _BIG_VMEM else 256
_DEF_TN = 512
_DEF_TK = 1024 if _BIG_VMEM else 512


def _cparams(*sem):
    return pltpu.CompilerParams(dimension_semantics=sem, vmem_limit_bytes=VMEM_LIMIT)


def _pick_tile(dim, target):
    """Largest divisor of dim that is <= target (full dim if already small).
    TODO(synk): replace with pl.cdiv grids + padded/masked tails so odd real-world dims
    (e.g. vocab 50265) get 128-lane-aligned blocks instead of small divisors."""
    if dim <= target:
        return dim
    for t in range(target, 0, -1):
        if dim % t == 0:
            return t
    return dim


# ----------------------------------------------------------------------------
# Pallas kernels
# ----------------------------------------------------------------------------

def _matmul_bias_act_kernel(x_ref, w_ref, b_ref, o_ref, acc_ref, *, activation):
    """y = act(x @ w + b), 3-D (M,N,K) tiled with f32 accumulator."""
    @pl.when(pl.program_id(2) == 0)
    def _():
        acc_ref[...] = jnp.zeros_like(acc_ref)

    acc_ref[...] += jnp.dot(x_ref[...].astype(MXU_DTYPE),
                            w_ref[...].astype(MXU_DTYPE),
                            preferred_element_type=jnp.float32)

    @pl.when(pl.program_id(2) == pl.num_programs(2) - 1)
    def _():
        y = acc_ref[...] + b_ref[...]
        if activation == "relu":
            y = jnp.maximum(y, 0.0)
        elif activation == "gelu":
            # TODO(synk): HF Roberta uses exact (erf) gelu; tanh approximation used here.
            y = jax.nn.gelu(y, approximate=True)
        o_ref[...] = y.astype(o_ref.dtype)


def fused_linear(x, w, b, activation="none", *, out_dtype=None,
                 tm=_DEF_TM, tn=_DEF_TN, tk=_DEF_TK):
    """y = act(x @ w + b).  x: (M,K), w: (K,N) (bf16 storage), b: (N,) f32."""
    M, K = x.shape
    K2, N = w.shape
    assert K == K2
    out_dtype = out_dtype if out_dtype is not None else x.dtype
    tm, tn, tk = _pick_tile(M, tm), _pick_tile(N, tn), _pick_tile(K, tk)
    grid = (M // tm, N // tn, K // tk)
    return pl.pallas_call(
        functools.partial(_matmul_bias_act_kernel, activation=activation),
        out_shape=jax.ShapeDtypeStruct((M, N), out_dtype),
        grid=grid,
        in_specs=[
            pl.BlockSpec((tm, tk), lambda i, j, k: (i, k)),
            pl.BlockSpec((tk, tn), lambda i, j, k: (k, j)),
            pl.BlockSpec((1, tn), lambda i, j, k: (0, j)),
        ],
        out_specs=pl.BlockSpec((tm, tn), lambda i, j, k: (i, j)),
        scratch_shapes=[pltpu.VMEM((tm, tn), jnp.float32)],
        compiler_params=_cparams("parallel", "parallel", "arbitrary"),
    )(x, w, b.reshape(1, N))


def _matmul_res_ln_kernel(x_ref, w_ref, b_ref, r_ref, g_ref, be_ref, o_ref, acc_ref, *, eps):
    """LayerNorm(x @ w + b + residual) with K-tiled accumulation (full N per tile)."""
    @pl.when(pl.program_id(1) == 0)
    def _():
        acc_ref[...] = jnp.zeros_like(acc_ref)

    acc_ref[...] += jnp.dot(x_ref[...].astype(MXU_DTYPE),
                            w_ref[...].astype(MXU_DTYPE),
                            preferred_element_type=jnp.float32)

    @pl.when(pl.program_id(1) == pl.num_programs(1) - 1)
    def _():
        y = acc_ref[...] + b_ref[...] + r_ref[...].astype(jnp.float32)
        mean = jnp.mean(y, axis=-1, keepdims=True)
        var = jnp.mean((y - mean) ** 2, axis=-1, keepdims=True)
        yn = (y - mean) * jax.lax.rsqrt(var + eps)
        o_ref[...] = (yn * g_ref[...] + be_ref[...]).astype(o_ref.dtype)


def linear_residual_ln(x, w, b, res, gamma, beta, *, out_dtype=MXU_DTYPE,
                       eps=1e-5, tm=_DEF_TM, tk=_DEF_TK):
    """LayerNorm((x @ w + b) + res).  Full N stays in-tile (needed for LN stats)."""
    M, K = x.shape
    K2, N = w.shape
    assert K == K2 and res.shape == (M, N)
    tm, tk = _pick_tile(M, tm), _pick_tile(K, tk)
    grid = (M // tm, K // tk)
    return pl.pallas_call(
        functools.partial(_matmul_res_ln_kernel, eps=eps),
        out_shape=jax.ShapeDtypeStruct((M, N), out_dtype),
        grid=grid,
        in_specs=[
            pl.BlockSpec((tm, tk), lambda i, k: (i, k)),
            pl.BlockSpec((tk, N), lambda i, k: (k, 0)),
            pl.BlockSpec((1, N), lambda i, k: (0, 0)),
            pl.BlockSpec((tm, N), lambda i, k: (i, 0)),
            pl.BlockSpec((1, N), lambda i, k: (0, 0)),
            pl.BlockSpec((1, N), lambda i, k: (0, 0)),
        ],
        out_specs=pl.BlockSpec((tm, N), lambda i, k: (i, 0)),
        scratch_shapes=[pltpu.VMEM((tm, N), jnp.float32)],
        compiler_params=_cparams("parallel", "arbitrary"),
    )(x, w, b.reshape(1, N), res, gamma.reshape(1, N), beta.reshape(1, N))


def _attention_kernel(q_ref, kv_ref, mask_ref, o_ref, *, n_heads, head_dim, scale):
    """One (batch, query-block) per grid step.  Per-head q/k/v are ref slices (direct
    strided VMEM loads), scores use dot_general on head_dim (no explicit transpose),
    and per-head context is stored directly into o_ref lane slices (no concat)."""
    H = n_heads * head_dim
    Sq = q_ref.shape[1]
    S = kv_ref.shape[1]
    # Hoist mask broadcast out of the head loop (JAX does not CSE broadcast_in_dim).
    mask = jnp.broadcast_to(mask_ref[0], (Sq, S)).astype(jnp.float32)
    # TODO(synk): pack heads (2 heads per 128-lane block or a head-batched dot_general)
    # so MXU contractions see K >= 128 at real head_dim=64 on v6e/v7x.
    for h in range(n_heads):
        lo = h * head_dim
        # fold scale into q once per head: one (Sq, dh) multiply instead of (Sq, S).
        q = (q_ref[0, :, lo:lo + head_dim].astype(jnp.float32) * scale).astype(MXU_DTYPE)
        k = kv_ref[0, :, H + lo:H + lo + head_dim]
        v = kv_ref[0, :, 2 * H + lo:2 * H + lo + head_dim]
        s = jax.lax.dot_general(q, k.astype(MXU_DTYPE),
                                (((1,), (1,)), ((), ())),
                                preferred_element_type=jnp.float32)
        s = s + mask
        s = s - jnp.max(s, axis=-1, keepdims=True)
        p = jnp.exp(s)
        p = p * pl.reciprocal(jnp.sum(p, axis=-1, keepdims=True), approx=True)
        ctx = jnp.dot(p.astype(MXU_DTYPE), v.astype(MXU_DTYPE),
                      preferred_element_type=jnp.float32)
        o_ref[0, :, lo:lo + head_dim] = ctx.astype(o_ref.dtype)


def mha_attention(qkv, add_mask, n_heads, *, tq=256):
    """qkv: (B, S, 3H) fused projections; add_mask: (B, 1, S) additive.  -> (B, S, H)."""
    B, S, H3 = qkv.shape
    H = H3 // 3
    dh = H // n_heads
    scale = 1.0 / math.sqrt(dh)
    tq = _pick_tile(S, tq)
    # qkv is passed twice: once row-blocked (query rows), once full-S (keys/values).
    return pl.pallas_call(
        functools.partial(_attention_kernel, n_heads=n_heads, head_dim=dh, scale=scale),
        out_shape=jax.ShapeDtypeStruct((B, S, H), qkv.dtype),
        grid=(B, S // tq),
        in_specs=[
            pl.BlockSpec((1, tq, H3), lambda b, qi: (b, qi, 0)),
            pl.BlockSpec((1, S, H3), lambda b, qi: (b, 0, 0)),
            pl.BlockSpec((1, 1, S), lambda b, qi: (b, 0, 0)),
        ],
        out_specs=pl.BlockSpec((1, tq, H), lambda b, qi: (b, qi, 0)),
        compiler_params=_cparams("parallel", "parallel"),
    )(qkv, qkv, add_mask)


def _layernorm_kernel(x_ref, g_ref, b_ref, o_ref, *, eps):
    x = x_ref[...].astype(jnp.float32)
    mean = jnp.mean(x, axis=-1, keepdims=True)
    var = jnp.mean((x - mean) ** 2, axis=-1, keepdims=True)
    y = (x - mean) * jax.lax.rsqrt(var + eps)
    o_ref[...] = (y * g_ref[...] + b_ref[...]).astype(o_ref.dtype)


def layer_norm(x, gamma, beta, eps=1e-5, *, tr=512, out_dtype=MXU_DTYPE):
    shp = x.shape
    flat = x.reshape(-1, shp[-1])
    R, H = flat.shape
    tr = _pick_tile(R, tr)
    out = pl.pallas_call(
        functools.partial(_layernorm_kernel, eps=eps),
        out_shape=jax.ShapeDtypeStruct(flat.shape, out_dtype),
        grid=(R // tr,),
        in_specs=[
            pl.BlockSpec((tr, H), lambda i: (i, 0)),
            pl.BlockSpec((1, H), lambda i: (0, 0)),
            pl.BlockSpec((1, H), lambda i: (0, 0)),
        ],
        out_specs=pl.BlockSpec((tr, H), lambda i: (i, 0)),
        compiler_params=_cparams("parallel"),
    )(flat, gamma.reshape(1, -1), beta.reshape(1, -1))
    return out.reshape(shp)


def _meanpool_kernel(x_ref, o_ref, acc_ref, *, inv_s):
    # torch.mean(last_hidden_states, dim=1): plain (unmasked) mean over the seq axis,
    # tiled over S with an f32 running-sum accumulator (bounded per-step VMEM).
    @pl.when(pl.program_id(1) == 0)
    def _():
        acc_ref[...] = jnp.zeros_like(acc_ref)

    acc_ref[...] += jnp.sum(x_ref[...].astype(jnp.float32), axis=1)

    @pl.when(pl.program_id(1) == pl.num_programs(1) - 1)
    def _():
        o_ref[...] = (acc_ref[...] * inv_s).astype(o_ref.dtype)


def mean_pool(x, *, tb=128, ts=512, out_dtype=jnp.float32):
    B, S, H = x.shape
    tb, ts = _pick_tile(B, tb), _pick_tile(S, ts)
    return pl.pallas_call(
        functools.partial(_meanpool_kernel, inv_s=1.0 / S),
        out_shape=jax.ShapeDtypeStruct((B, H), out_dtype),
        grid=(B // tb, S // ts),
        in_specs=[pl.BlockSpec((tb, ts, H), lambda i, s: (i, s, 0))],
        out_specs=pl.BlockSpec((tb, H), lambda i, s: (i, 0)),
        scratch_shapes=[pltpu.VMEM((tb, H), jnp.float32)],
        compiler_params=_cparams("parallel", "arbitrary"),
    )(x)


def _logsoftmax_kernel(x_ref, o_ref):
    x = x_ref[...].astype(jnp.float32)
    mx = jnp.max(x, axis=-1, keepdims=True)
    lse = jnp.log(jnp.sum(jnp.exp(x - mx), axis=-1, keepdims=True)) + mx
    o_ref[...] = (x - lse).astype(o_ref.dtype)


def log_softmax_rows(x, *, tr=256, out_dtype=jnp.float32):
    """Row-blocked LogSoftmax over the last dim of a 2-D array."""
    R, V = x.shape
    tr = _pick_tile(R, tr)
    # TODO(synk): pad real vocab (e.g. 50265 -> 50304) to a multiple of 128 for
    # lane-aligned, unmasked stores; toy vocab is small enough to keep whole.
    return pl.pallas_call(
        _logsoftmax_kernel,
        out_shape=jax.ShapeDtypeStruct((R, V), out_dtype),
        grid=(R // tr,),
        in_specs=[pl.BlockSpec((tr, V), lambda i: (i, 0))],
        out_specs=pl.BlockSpec((tr, V), lambda i: (i, 0)),
        compiler_params=_cparams("parallel"),
    )(x)


# ----------------------------------------------------------------------------
# Model (glue around the Pallas kernels)
# ----------------------------------------------------------------------------

def encoder_layer(lp, x, add_mask, n_heads):
    B, S, H = x.shape
    xf = x.reshape(B * S, H)

    qkv = fused_linear(xf, lp["wqkv"], lp["bqkv"], out_dtype=MXU_DTYPE)   # one matmul for Q,K,V
    ctx = mha_attention(qkv.reshape(B, S, 3 * H), add_mask, n_heads)

    # attention output projection + residual + LayerNorm fused
    x1 = linear_residual_ln(ctx.reshape(B * S, H), lp["wo"], lp["bo"],
                            xf, lp["ln1_g"], lp["ln1_b"])

    inter = fused_linear(x1, lp["w1"], lp["b1"], activation="gelu", out_dtype=MXU_DTYPE)
    # FFN second linear + residual + LayerNorm fused
    x2 = linear_residual_ln(inter, lp["w2"], lp["b2"],
                            x1, lp["ln2_g"], lp["ln2_b"])
    return x2.reshape(B, S, H)


def roberta_encoder(ep, input_ids, attention_mask, n_heads):
    B, S = input_ids.shape
    emb = (
        ep["word_emb"][input_ids]                    # (B,S,H) gather (XLA glue)
        + ep["pos_emb"][None, :S, :]                 # TODO(synk): Roberta padding-aware position ids simplified to 0..S-1
        + ep["type_emb"][None, :, :]
    )
    x = layer_norm(emb, ep["emb_ln_g"], ep["emb_ln_b"])
    add_mask = ((1.0 - attention_mask.astype(jnp.float32)) * -1e9)[:, None, :]  # (B,1,S)
    for lp in ep["layers"]:
        x = encoder_layer(lp, x, add_mask, n_heads)
    return x


def cvae_forward(params, input_ids, attention_mask, eps_key):
    cfg = params["cfg"]
    B, S = input_ids.shape
    V, L = cfg["vocab_size"], cfg["latent_dim"]

    # encode
    hidden = roberta_encoder(params["enc"], input_ids, attention_mask, cfg["n_heads"])
    pooled = mean_pool(hidden)                                                    # (B, H) f32
    muvar = fused_linear(pooled, params["fc_muvar_w"], params["fc_muvar_b"],
                         out_dtype=jnp.float32)                                   # fc_mu & fc_var fused
    mu, log_var = muvar[:, :L], muvar[:, L:]

    # reparameterize: tiny (B,L) elementwise op — left to XLA (no kernel-launch overhead)
    eps = jax.random.normal(eps_key, mu.shape, mu.dtype)
    z = mu + eps * jnp.exp(0.5 * log_var)

    # decode: Linear -> ReLU -> Linear (N-tiled over S*V, bf16 weight) -> LogSoftmax kernel
    h = fused_linear(z, params["dec1_w"], params["dec1_b"],
                     activation="relu", out_dtype=MXU_DTYPE)                      # (B, H)
    # TODO(synk): on v7x the dec2 weight (largest tensor) should be fp8 with f32 accumulation.
    logits = fused_linear(h, params["dec2_w"], params["dec2_b"],
                          out_dtype=MXU_DTYPE)                                    # (B, S*V) bf16
    logp = log_softmax_rows(logits.reshape(B * S, V)).reshape(B, S, V)            # (B, S, V) f32
    return logp, mu, log_var


# ----------------------------------------------------------------------------
# Deterministic parameter init (weights stored bf16; biases / LN params f32)
# ----------------------------------------------------------------------------

def init_params(key, *, vocab_size, hidden, n_heads, n_layers, latent_dim, max_seq_len):
    ks = iter(jax.random.split(key, 64))

    def w(shape, scale=0.02):
        return (jax.random.normal(next(ks), shape, jnp.float32) * scale).astype(MXU_DTYPE)

    def zeros(shape):
        return jnp.zeros(shape, jnp.float32)

    def ones(shape):
        return jnp.ones(shape, jnp.float32)

    inter = 4 * hidden
    layers = []
    for _ in range(n_layers):
        layers.append(dict(
            wqkv=w((hidden, 3 * hidden)), bqkv=zeros((3 * hidden,)),
            wo=w((hidden, hidden)), bo=zeros((hidden,)),
            ln1_g=ones((hidden,)), ln1_b=zeros((hidden,)),
            w1=w((hidden, inter)), b1=zeros((inter,)),
            w2=w((inter, hidden)), b2=zeros((hidden,)),
            ln2_g=ones((hidden,)), ln2_b=zeros((hidden,)),
        ))

    enc = dict(
        word_emb=w((vocab_size, hidden)),
        pos_emb=w((max_seq_len, hidden)),
        type_emb=w((1, hidden)),
        emb_ln_g=ones((hidden,)), emb_ln_b=zeros((hidden,)),
        layers=layers,
    )

    params = dict(
        cfg=dict(vocab_size=vocab_size, hidden=hidden, n_heads=n_heads,
                 latent_dim=latent_dim, max_seq_len=max_seq_len),
        enc=enc,
        fc_muvar_w=w((hidden, 2 * latent_dim)), fc_muvar_b=zeros((2 * latent_dim,)),
        dec1_w=w((latent_dim, hidden)), dec1_b=zeros((hidden,)),
        dec2_w=w((hidden, max_seq_len * vocab_size)), dec2_b=zeros((max_seq_len * vocab_size,)),
    )
    return params


# ----------------------------------------------------------------------------
# Main
# ----------------------------------------------------------------------------

if __name__ == "__main__":
    B, S, H, NH, L, V, NLAYERS = 2, 8, 32, 4, 16, 64, 2

    root = jax.random.PRNGKey(0)
    k_param, k_ids, k_mask, k_eps = jax.random.split(root, 4)

    params = init_params(k_param, vocab_size=V, hidden=H, n_heads=NH,
                         n_layers=NLAYERS, latent_dim=L, max_seq_len=S)

    input_ids = jax.random.randint(k_ids, (B, S), 0, V, dtype=jnp.int32)
    attention_mask = jnp.ones((B, S), jnp.float32).at[1, S - 2:].set(0.0)  # pad tail of batch 1

    logp, mu, log_var = cvae_forward(params, input_ids, attention_mask, k_eps)
    logp = jax.block_until_ready(logp)
    mu = jax.block_until_ready(mu)
    log_var = jax.block_until_ready(log_var)

    assert logp.shape == (B, S, V)
    assert mu.shape == (B, L) and log_var.shape == (B, L)
    # log-softmax sanity: rows exponentiate to probability simplex
    assert bool(jnp.allclose(jnp.exp(logp).sum(-1), 1.0, atol=1e-4))
    assert bool(jnp.all(jnp.isfinite(logp)))

    print("KERNEL_OK")
</pallas_src>

<mosaic_0001>
module attributes {stable_mosaic.version = 11 : i64} {
  func.func @_layernorm_kernel(%arg0: i32, %arg1: memref<16x32xbf16, #tpu.memory_space<vmem>>, %arg2: memref<1x32xf32, #tpu.memory_space<vmem>>, %arg3: memref<1x32xf32, #tpu.memory_space<vmem>>, %arg4: memref<16x32xbf16, #tpu.memory_space<vmem>>) attributes {dimension_semantics = [#tpu.dimension_semantics<parallel>], iteration_bounds = array<i64: 1>, scalar_prefetch = 0 : i64, scratch_operands = 0 : i64, tpu.core_type = #tpu.core_type<tc>, window_params = [{transform_indices = @transform_0, window_bounds = array<i64: 16, 32>}, {pipeline_mode = #tpu.pipeline_mode<synchronous>, transform_indices = @transform_1, window_bounds = array<i64: 1, 32>}, {pipeline_mode = #tpu.pipeline_mode<synchronous>, transform_indices = @transform_2, window_bounds = array<i64: 1, 32>}, {transform_indices = @transform_3, window_bounds = array<i64: 16, 32>}]} {
    %c0 = arith.constant 0 : index
    %c0_0 = arith.constant 0 : index
    %0 = vector.load %arg1[%c0, %c0_0] : memref<16x32xbf16, #tpu.memory_space<vmem>>, vector<16x32xbf16>
    %1 = arith.extf %0 : vector<16x32xbf16> to vector<16x32xf32>
    %cst = arith.constant dense<0.000000e+00> : vector<16xf32>
    %2 = vector.multi_reduction <add>, %1, %cst [1] : vector<16x32xf32> to vector<16xf32>
    %3 = vector.shape_cast %2 : vector<16xf32> to vector<16x1xf32>
    %cst_1 = arith.constant 3.200000e+01 : f32
    %4 = vector.broadcast %cst_1 : f32 to vector<16x1xf32>
    %5 = arith.divf %3, %4 : vector<16x1xf32>
    %6 = vector.broadcast %5 : vector<16x1xf32> to vector<16x32xf32>
    %7 = arith.subf %1, %6 : vector<16x32xf32>
    %8 = arith.mulf %7, %7 : vector<16x32xf32>
    %cst_2 = arith.constant dense<0.000000e+00> : vector<16xf32>
    %9 = vector.multi_reduction <add>, %8, %cst_2 [1] : vector<16x32xf32> to vector<16xf32>
    %10 = vector.shape_cast %9 : vector<16xf32> to vector<16x1xf32>
    %cst_3 = arith.constant 3.200000e+01 : f32
    %11 = vector.broadcast %cst_3 : f32 to vector<16x1xf32>
    %12 = arith.divf %10, %11 : vector<16x1xf32>
    %13 = vector.broadcast %5 : vector<16x1xf32> to vector<16x32xf32>
    %14 = arith.subf %1, %13 : vector<16x32xf32>
    %cst_4 = arith.constant 9.99999974E-6 : f32
    %15 = vector.broadcast %cst_4 : f32 to vector<16x1xf32>
    %16 = arith.addf %12, %15 : vector<16x1xf32>
    %17 = math.rsqrt %16 : vector<16x1xf32>
    %18 = vector.broadcast %17 : vector<16x1xf32> to vector<16x32xf32>
    %19 = arith.mulf %14, %18 : vector<16x32xf32>
    %c0_5 = arith.constant 0 : index
    %c0_6 = arith.constant 0 : index
    %20 = vector.load %arg2[%c0_5, %c0_6] : memref<1x32xf32, #tpu.memory_space<vmem>>, vector<1x32xf32>
    %21 = vector.broadcast %20 : vector<1x32xf32> to vector<16x32xf32>
    %22 = arith.mulf %19, %21 : vector<16x32xf32>
    %c0_7 = arith.constant 0 : index
    %c0_8 = arith.constant 0 : index
    %23 = vector.load %arg3[%c0_7, %c0_8] : memref<1x32xf32, #tpu.memory_space<vmem>>, vector<1x32xf32>
    %24 = vector.broadcast %23 : vector<1x32xf32> to vector<16x32xf32>
    %25 = arith.addf %22, %24 : vector<16x32xf32>
    %26 = arith.truncf %25 : vector<16x32xf32> to vector<16x32xbf16>
    %c0_9 = arith.constant 0 : index
    %c0_10 = arith.constant 0 : index
    %27 = vector.load %arg4[%c0_9, %c0_10] : memref<16x32xbf16, #tpu.memory_space<vmem>>, vector<16x32xbf16>
    tpu.vector_store %arg4[%c0_9, %c0_10], %26 {strides = array<i32>} : memref<16x32xbf16, #tpu.memory_space<vmem>>, vector<16x32xbf16>,
    return
  }
  func.func @transform_0(%arg0: i32) -> (i32, i32) {
    %c0_i32 = arith.constant 0 : i32
    %c0_i32_0 = arith.constant 0 : i32
    return %arg0, %c0_i32 : i32, i32
  }
  func.func @transform_1(%arg0: i32) -> (i32, i32) {
    %c0_i32 = arith.constant 0 : i32
    %c0_i32_0 = arith.constant 0 : i32
    %c0_i32_1 = arith.constant 0 : i32
    return %c0_i32, %c0_i32_0 : i32, i32
  }
  func.func @transform_2(%arg0: i32) -> (i32, i32) {
    %c0_i32 = arith.constant 0 : i32
    %c0_i32_0 = arith.constant 0 : i32
    %c0_i32_1 = arith.constant 0 : i32
    return %c0_i32, %c0_i32_0 : i32, i32
  }
  func.func @transform_3(%arg0: i32) -> (i32, i32) {
    %c0_i32 = arith.constant 0 : i32
    %c0_i32_0 = arith.constant 0 : i32
    return %arg0, %c0_i32 : i32, i32
  }
}

</mosaic_0001>

<bundles_post_ra>
// kernel: tpu_custom_call.1
= control target key start
LH: loop header
LB: loop body
LE: loop exit
PB: predicated region body
PF: predicated region fallthrough
CT: control target
= control target key end

     0   :  { %8 = vsyncpa [#allocation3], 0  ;;  %s282_s0 = inlined_call_operand.hbm [shape: bf16[16,32], index: 0, kind: input, shape index: {}]   ;;  %s283_s1 = inlined_call_operand.hbm [shape: f32[1,32], index: 1, kind: input, shape index: {}]   ;;  %s284_s2 = inlined_call_operand.vmem [shape: f32[1,32], index: 2, kind: input, shape index: {}]   ;;  %s285_s3 = inlined_call_operand.hbm [shape: bf16[16,32], index: 3, kind: output, shape index: {}]  }
   0x1   :  { %9 = vsyncpa [#allocation6], 0 }
   0x2   :  { %10 = vsyncpa [#allocation4], 0  ;;  %s15_s14 = sshll.u32 %s282_s0, 4  ;;  %s234_s15 = smov [#allocation2]   ;;  %s16_s14 = int_to_ptr.hbm [resolvable:$true] %s15_s14 }
   0x3   :  { %s17_s16 = sshll.u32 %s234_s15, 4  ;;  %s29_s19 = sshll.u32 %s283_s1, 4  ;;  %s18_s16 = int_to_ptr.vmem [resolvable:$true] %s17_s16  ;;  %s30_s19 = int_to_ptr.hbm [resolvable:$true] %s29_s19 }
   0x4   :  { %s235_s20 = smov 64   ;;  %s236_s21 = smov 4  }
   0x5   :  { %23 = dma.hbm_to_vmem [thread:$0]  %s16_s14, 128, %s18_s16, [#allocation3], %s235_s20, %s235_s20, %s236_s21  }
   0x6   :  { %s237_s22 = smov [#allocation5]  }
   0x7   :  { %s31_s23 = sshll.u32 %s237_s22, 4  ;;  %s32_s23 = int_to_ptr.vmem [resolvable:$true] %s31_s23 }
   0x8   :  { %34 = dma.hbm_to_vmem [thread:$0]  %s30_s19, 16, %s32_s23, [#allocation6]  }
   0x9   :  { %228 = dma.done.wait [#allocation3], 128  }
   0xa   :  { %229 = vsyncadd [#allocation3], 4294967168 }
   0xb   :  { %230 = dma.done.wait [#allocation6], 16  }
   0xc   :  { %231 = vsyncadd [#allocation6], 4294967280  ;;  %v139_v0 = vld [vmem:[#allocation2] sm:$0xff]   ;;  %vm49_vm0 = vcmask 261120   ;;  %v238_v5 = vmov 32.0   ;;  %vm115_vm7 = vcmask 257024  }
   0xd   :  { %v140_v1 = vunpack.c.l.bf16 %v139_v0  ;;  %v141_v3 = vunpack.c.h.bf16 %v139_v0  ;;  %150 = vrcp.f32 %v238_v5  ;;  %v148_v36 = vld [vmem:[#allocation5] ss:$0 sm:$0xff]  ;;  %v149_v40 = vld [vmem:[%s284_s2] ss:$0 sm:$0xff]  ;;  %s239_s24 = smov [#allocation7]   ;;  %s124_s2 = sshll.u32 %s285_s3, 4  ;;  %s125_s2 = int_to_ptr.hbm [resolvable:$true] %s124_s2 }
   0xe   :  { %s122_s25 = sshll.u32 %s239_s24, 4  ;;  %s123_s25 = int_to_ptr.vmem [resolvable:$true] %s122_s25 }
   0xf   :  { %v50_v2 = vsel %vm49_vm0, %v140_v1, 0.0  ;;  %v53_v4 = vsel %vm49_vm0, %v141_v3, 0.0 }
  0x10   :  { %51 = vadd.xlane.f32.xlu0 %v50_v2 }
  0x13   :  { %v151_v6 = vpop.eup %150 }
  0x14   :  { %v57_v7 = vmul.f32 32.0, %v151_v6  ;;  %vm61_vm1 = vweird.f32 %v151_v6 }
  0x16   :  { %v58_v8 = vsub.f32 1.0, %v57_v7 }
  0x18   :  { %54 = vadd.xlane.f32.xlu0 %v53_v4  ;;  %v59_v9 = vmul.f32 %v151_v6, %v58_v8 }
  0x1a   :  { %v60_v10 = vadd.f32 %v151_v6, %v59_v9 }
  0x1c   :  { %v62_v11 = vsel %vm61_vm1, %v151_v6, %v60_v10 }
  0x83   :  { %v52_v12 = vpop.xlane.xlu0 %51 }
  0x84   :  { %v63_v13 = vmul.f32 %v62_v11, %v52_v12 }
  0x86   :  { %v65_v14 = vsub.f32 %v140_v1, %v63_v13 }
  0x88   :  { %v67_v15 = vmul.f32 %v65_v14, %v65_v14 }
  0x8a   :  { %v69_v16 = vsel %vm49_vm0, %v67_v15, 0.0 }
  0x8b   :  { %70 = vadd.xlane.f32.xlu1 %v69_v16  ;;  %v55_v17 = vpop.xlane.xlu0 %54 }
  0x8c   :  { %v64_v18 = vmul.f32 %v62_v11, %v55_v17 }
  0x8e   :  { %v66_v19 = vsub.f32 %v141_v3, %v64_v18 }
  0x90   :  { %v68_v20 = vmul.f32 %v66_v19, %v66_v19 }
  0x92   :  { %v72_v21 = vsel %vm49_vm0, %v68_v20, 0.0 }
  0x93   :  { %73 = vadd.xlane.f32.xlu1 %v72_v21 }
  0xfe   :  { %v71_v22 = vpop.xlane.xlu1 %70 }
  0xff   :  { %v75_v23 = vmul.f32 %v71_v22, %v62_v11 }
 0x101   :  { %v77_v24 = vadd.f32 1e-05, %v75_v23 }
 0x103   :  { %152 = vrsqrt.f32 %v77_v24  ;;  %vm85_vm3 = vweird.f32 %v77_v24 }
 0x106   :  { %v74_v25 = vpop.xlane.xlu1 %73 }
 0x107   :  { %v76_v26 = vmul.f32 %v74_v25, %v62_v11 }
 0x109   :  { %v153_v27 = vpop.eup %152  ;;  %v78_v28 = vadd.f32 1e-05, %v76_v26 }
 0x10a   :  { %v80_v29 = vmul.f32 %v153_v27, %v77_v24  ;;  %vm86_vm2 = vweird.f32 %v153_v27 }
 0x10b   :  { %154 = vrsqrt.f32 %v78_v28  ;;  %vm87_vm4 = vmor %vm85_vm3, %vm86_vm2  ;;  %vm95_vm6 = vweird.f32 %v78_v28 }
 0x10c   :  { %v81_v30 = vmul.f32 %v153_v27, %v80_v29 }
 0x10e   :  { %v82_v31 = vmul.f32 0.5, %v81_v30 }
 0x110   :  { %v83_v32 = vsub.f32 1.5, %v82_v31 }
 0x111   :  { %v155_v33 = vpop.eup %154 }
 0x112   :  { %v84_v34 = vmul.f32 %v153_v27, %v83_v32  ;;  %v90_v35 = vmul.f32 %v155_v33, %v78_v28  ;;  %vm96_vm5 = vweird.f32 %v155_v33 }
 0x113   :  { %vm97_vm8 = vmor %vm95_vm6, %vm96_vm5 }
 0x114   :  { %v88_v37 = vsel %vm87_vm4, %v153_v27, %v84_v34  ;;  %v91_v38 = vmul.f32 %v155_v33, %v90_v35 }
 0x115   :  { %v99_v39 = vmul.f32 %v88_v37, %v65_v14 }
 0x116   :  { %v92_v41 = vmul.f32 0.5, %v91_v38 }
 0x117   :  { %v105_v42 = vmul.f32 %v148_v36, %v99_v39 }
 0x118   :  { %v93_v43 = vsub.f32 1.5, %v92_v41 }
 0x119   :  { %v111_v44 = vadd.f32 %v149_v40, %v105_v42 }
 0x11a   :  { %v94_v45 = vmul.f32 %v155_v33, %v93_v43 }
 0x11b   :  { %v113_v46 = vpack.c.bf16 %v111_v44, %v111_v44 }
 0x11c   :  { %v98_v47 = vsel %vm97_vm8, %v155_v33, %v94_v45 }
 0x11d   :  { %v100_v48 = vmul.f32 %v98_v47, %v66_v19  ;;  %116 = vst.msk [vmem:[#allocation7] sm:$0xf] %vm115_vm7, %v113_v46 }
 0x11f   :  { %v106_v49 = vmul.f32 %v148_v36, %v100_v48 }
 0x121   :  { %v112_v50 = vadd.f32 %v149_v40, %v106_v49 }
 0x123   :  { %v114_v51 = vpack.c.bf16 %v112_v50, %v112_v50 }
 0x125   :  { %117 = vst.msk [vmem:[#allocation7 + $0x4] sm:$0xf] %vm115_vm7, %v114_v51 }
 0x126   :  { %130 = dma.vmem_to_hbm [thread:$0]  %s123_s25, 128, %s125_s2, [#allocation4], %s235_s20, %s235_s20, %s236_s21  }
 0x127   :  { %232 = dma.done.wait [#allocation4], 128  }
 0x128   :  { %233 = vsyncadd [#allocation4], 4294967168 }
 0x129   :  { %135 = vsyncpa [#allocation3], 1 }
 0x12a   :  { %136 = vsyncpa [#allocation6], 1 }
 0x12b   :  { %137 = vsyncpa [#allocation4], 1 }

</bundles_post_ra>
